<compile_context>
chip_gen: v6e
topology: v6e:2x2x1
jax: 0.10.0
libtpu: 0.0.40
codegen_flags: <defaults>
</compile_context>

<pallas_src>
import jax
import jax.numpy as jnp
from jax.experimental import pallas as pl
from jax.experimental.pallas import tpu as pltpu


def _se_kernel(x_ref, w1t_ref, b1_ref, w2t_ref, b2_ref, o_ref):
    # x_ref  : (Bt, C, HW)  input slab (C on sublanes, HW on lanes)
    # w1t_ref: (C, Cr)      reduce 1x1-conv weight, transposed
    # b1_ref : (1, Cr)
    # w2t_ref: (Cr, C)      expand 1x1-conv weight, transposed
    # b2_ref : (1, C)
    # o_ref  : (Bt, C, HW)
    x = x_ref[...]                               # native dtype; no full-slab f32 cast
    hw = x.shape[-1]

    # F.avg_pool2d(x, [h, w]) == global average pool: lane-axis reduction,
    # accumulated in f32.
    pooled = jnp.sum(x, axis=-1, dtype=jnp.float32) * (1.0 / hw)      # (Bt, C)

    # reduce: 1x1 conv == matmul over channels, + bias, ReLU
    z = jnp.dot(pooled, w1t_ref[...], preferred_element_type=jnp.float32)
    z = jnp.maximum(z + b1_ref[...], 0.0)                             # (Bt, Cr)

    # expand: 1x1 conv + bias, sigmoid (EUP)
    s = jnp.dot(z, w2t_ref[...], preferred_element_type=jnp.float32)
    s = jax.nn.sigmoid(s + b2_ref[...])                               # (Bt, C)

    # per-channel rescale of the input (broadcast along the HW lane axis)
    scale = s.astype(x.dtype)[:, :, None]                             # (Bt, C, 1)
    o_ref[...] = (x * scale).astype(o_ref.dtype)


def _pick_block_batch(B, C, HW, itemsize, target_bytes=2 << 20):
    """Batch elements per grid step: ~1-2 MiB blocks, but keep >=2 grid steps."""
    per_elem = max(1, C * HW * itemsize)
    bt = max(1, min(B, int(target_bytes // per_elem)))
    if B >= 2:
        bt = min(bt, max(1, B // 2))   # leave work for both TensorCores on v7x
    while B % bt:                      # full blocks only (no ragged tail)
        bt -= 1
    return bt


@jax.jit
def squeeze_excitation(x_nchw, w1, b1, w2, b2):
    """x_nchw: (B, C, H, W); w1: (Cr, C, 1, 1); b1: (Cr,); w2: (C, Cr, 1, 1); b2: (C,)."""
    B, C, H, W = x_nchw.shape
    Cr = w1.shape[0]
    HW = H * W
    itemsize = jnp.dtype(x_nchw.dtype).itemsize

    x_slab = x_nchw.reshape(B, C, HW)        # free view of NCHW, no transpose
    w1t = w1.reshape(Cr, C).T                # (C, Cr)
    w2t = w2.reshape(C, Cr).T                # (Cr, C)
    b1r = b1.reshape(1, Cr)
    b2r = b2.reshape(1, C)

    bt = _pick_block_batch(B, C, HW, itemsize)
    grid = (B // bt,)

    cost = pl.CostEstimate(
        flops=2 * B * C * HW + 4 * B * C * Cr,
        transcendentals=B * C,
        bytes_accessed=2 * B * C * HW * itemsize,
    )

    out_slab = pl.pallas_call(
        _se_kernel,
        out_shape=jax.ShapeDtypeStruct((B, C, HW), x_nchw.dtype),
        grid_spec=pltpu.PrefetchScalarGridSpec(
            num_scalar_prefetch=0,
            grid=grid,
            in_specs=[
                pl.BlockSpec((bt, C, HW), lambda b: (b, 0, 0)),
                # Constant index maps: weights/biases are DMA'd once and
                # revisited, not re-fetched every grid step.
                pl.BlockSpec((C, Cr), lambda b: (0, 0)),
                pl.BlockSpec((1, Cr), lambda b: (0, 0)),
                pl.BlockSpec((Cr, C), lambda b: (0, 0)),
                pl.BlockSpec((1, C), lambda b: (0, 0)),
            ],
            out_specs=pl.BlockSpec((bt, C, HW), lambda b: (b, 0, 0)),
        ),
        compiler_params=pltpu.CompilerParams(
            dimension_semantics=("parallel",)),
        cost_estimate=cost,
    )(x_slab, w1t, b1r, w2t, b2r)

    return out_slab.reshape(B, C, H, W)      # free view back to NCHW


def _reference(x, w1, b1, w2, b2):
    """Pure-JAX reference matching the PyTorch forward exactly (NCHW)."""
    B, C, H, W = x.shape
    Cr = w1.shape[0]
    pooled = jnp.mean(x, axis=(2, 3))                                  # (B, C)
    z = jnp.dot(pooled, w1.reshape(Cr, C).T,
                precision=jax.lax.Precision.HIGHEST) + b1              # (B, Cr)
    z = jnp.maximum(z, 0.0)
    s = jnp.dot(z, w2.reshape(C, Cr).T,
                precision=jax.lax.Precision.HIGHEST) + b2              # (B, C)
    s = jax.nn.sigmoid(s)
    return x * s[:, :, None, None]


if __name__ == "__main__":
    # in_channels must satisfy int(in_channels * 0.0625) >= 1  ->  C = 64, Cr = 4
    B, C, H, W = 4, 64, 16, 16
    rd_ratio = 0.0625
    Cr = int(C * rd_ratio)

    key = jax.random.PRNGKey(0)
    kx, k1, k2, k3, k4 = jax.random.split(key, 5)

    x = jax.random.normal(kx, (B, C, H, W), dtype=jnp.float32)
    # deterministic synthetic parameters (match nn.Conv2d weight/bias shapes)
    w1 = jax.random.normal(k1, (Cr, C, 1, 1), dtype=jnp.float32) * 0.1   # reduce.weight
    b1 = jax.random.normal(k2, (Cr,), dtype=jnp.float32) * 0.1           # reduce.bias
    w2 = jax.random.normal(k3, (C, Cr, 1, 1), dtype=jnp.float32) * 0.1   # expand.weight
    b2 = jax.random.normal(k4, (C,), dtype=jnp.float32) * 0.1            # expand.bias

    out = jax.block_until_ready(squeeze_excitation(x, w1, b1, w2, b2))
    ref = _reference(x, w1, b1, w2, b2)

    assert out.shape == (B, C, H, W)
    # Tolerance covers MXU bf16-pass rounding of the two tiny f32 matmuls.
    assert jnp.allclose(out, ref, atol=1e-3, rtol=1e-3), "mismatch vs reference"

    print("KERNEL_OK")
</pallas_src>

<mosaic_0001>
module attributes {stable_mosaic.version = 11 : i64} {
  func.func @_se_kernel(%arg0: i32, %arg1: memref<2x64x256xf32, #tpu.memory_space<vmem>>, %arg2: memref<64x4xf32, #tpu.memory_space<vmem>>, %arg3: memref<1x4xf32, #tpu.memory_space<vmem>>, %arg4: memref<4x64xf32, #tpu.memory_space<vmem>>, %arg5: memref<1x64xf32, #tpu.memory_space<vmem>>, %arg6: memref<2x64x256xf32, #tpu.memory_space<vmem>>) attributes {dimension_semantics = [#tpu.dimension_semantics<parallel>], iteration_bounds = array<i64: 2>, scalar_prefetch = 0 : i64, scratch_operands = 0 : i64, tpu.core_type = #tpu.core_type<tc>, window_params = [{transform_indices = @transform_0, window_bounds = array<i64: 2, 64, 256>}, {pipeline_mode = #tpu.pipeline_mode<synchronous>, transform_indices = @transform_1, window_bounds = array<i64: 64, 4>}, {pipeline_mode = #tpu.pipeline_mode<synchronous>, transform_indices = @transform_2, window_bounds = array<i64: 1, 4>}, {pipeline_mode = #tpu.pipeline_mode<synchronous>, transform_indices = @transform_3, window_bounds = array<i64: 4, 64>}, {pipeline_mode = #tpu.pipeline_mode<synchronous>, transform_indices = @transform_4, window_bounds = array<i64: 1, 64>}, {transform_indices = @transform_5, window_bounds = array<i64: 2, 64, 256>}]} {
    %c0 = arith.constant 0 : index
    %c0_0 = arith.constant 0 : index
    %c0_1 = arith.constant 0 : index
    %0 = vector.load %arg1[%c0, %c0_0, %c0_1] : memref<2x64x256xf32, #tpu.memory_space<vmem>>, vector<2x64x256xf32>
    %cst = arith.constant dense<0.000000e+00> : vector<2x64xf32>
    %1 = vector.multi_reduction <add>, %0, %cst [2] : vector<2x64x256xf32> to vector<2x64xf32>
    %cst_2 = arith.constant 3.906250e-03 : f32
    %2 = vector.broadcast %cst_2 : f32 to vector<2x64xf32>
    %3 = arith.mulf %1, %2 : vector<2x64xf32>
    %c0_3 = arith.constant 0 : index
    %c0_4 = arith.constant 0 : index
    %4 = vector.load %arg2[%c0_3, %c0_4] : memref<64x4xf32, #tpu.memory_space<vmem>>, vector<64x4xf32>
    %cst_5 = arith.constant dense<0.000000e+00> : vector<2x4xf32>
    %5 = tpu.matmul %3, %4, %cst_5 {dimension_numbers = #tpu.dot_dimension_numbers<[1], [0], [0], [1], [0, 0, 1, 1], [], []>} : vector<2x64xf32>, vector<64x4xf32>, vector<2x4xf32> -> vector<2x4xf32>
    %c0_6 = arith.constant 0 : index
    %c0_7 = arith.constant 0 : index
    %6 = vector.load %arg3[%c0_6, %c0_7] : memref<1x4xf32, #tpu.memory_space<vmem>>, vector<1x4xf32>
    %7 = vector.broadcast %6 : vector<1x4xf32> to vector<2x4xf32>
    %8 = arith.addf %5, %7 : vector<2x4xf32>
    %cst_8 = arith.constant 0.000000e+00 : f32
    %9 = vector.broadcast %cst_8 : f32 to vector<2x4xf32>
    %10 = arith.maximumf %8, %9 : vector<2x4xf32>
    %c0_9 = arith.constant 0 : index
    %c0_10 = arith.constant 0 : index
    %11 = vector.load %arg4[%c0_9, %c0_10] : memref<4x64xf32, #tpu.memory_space<vmem>>, vector<4x64xf32>
    %cst_11 = arith.constant dense<0.000000e+00> : vector<2x64xf32>
    %12 = tpu.matmul %10, %11, %cst_11 {dimension_numbers = #tpu.dot_dimension_numbers<[1], [0], [0], [1], [0, 0, 1, 1], [], []>} : vector<2x4xf32>, vector<4x64xf32>, vector<2x64xf32> -> vector<2x64xf32>
    %c0_12 = arith.constant 0 : index
    %c0_13 = arith.constant 0 : index
    %13 = vector.load %arg5[%c0_12, %c0_13] : memref<1x64xf32, #tpu.memory_space<vmem>>, vector<1x64xf32>
    %14 = vector.broadcast %13 : vector<1x64xf32> to vector<2x64xf32>
    %15 = arith.addf %12, %14 : vector<2x64xf32>
    %16 = arith.negf %15 : vector<2x64xf32>
    %17 = math.exp %16 : vector<2x64xf32>
    %cst_14 = arith.constant 1.000000e+00 : f32
    %18 = vector.broadcast %cst_14 : f32 to vector<2x64xf32>
    %19 = arith.addf %18, %17 : vector<2x64xf32>
    %20 = arith.divf %18, %19 : vector<2x64xf32>
    %21 = vector.shape_cast %20 : vector<2x64xf32> to vector<2x64x1xf32>
    %22 = vector.broadcast %21 : vector<2x64x1xf32> to vector<2x64x256xf32>
    %23 = arith.mulf %0, %22 : vector<2x64x256xf32>
    %c0_15 = arith.constant 0 : index
    %c0_16 = arith.constant 0 : index
    %c0_17 = arith.constant 0 : index
    %24 = vector.load %arg6[%c0_15, %c0_16, %c0_17] : memref<2x64x256xf32, #tpu.memory_space<vmem>>, vector<2x64x256xf32>
    tpu.vector_store %arg6[%c0_15, %c0_16, %c0_17], %23 {strides = array<i32>} : memref<2x64x256xf32, #tpu.memory_space<vmem>>, vector<2x64x256xf32>,
    return
  }
  func.func @transform_0(%arg0: i32) -> (i32, i32, i32) {
    %c0_i32 = arith.constant 0 : i32
    %c0_i32_0 = arith.constant 0 : i32
    %c0_i32_1 = arith.constant 0 : i32
    return %arg0, %c0_i32, %c0_i32_0 : i32, i32, i32
  }
  func.func @transform_1(%arg0: i32) -> (i32, i32) {
    %c0_i32 = arith.constant 0 : i32
    %c0_i32_0 = arith.constant 0 : i32
    %c0_i32_1 = arith.constant 0 : i32
    return %c0_i32, %c0_i32_0 : i32, i32
  }
  func.func @transform_2(%arg0: i32) -> (i32, i32) {
    %c0_i32 = arith.constant 0 : i32
    %c0_i32_0 = arith.constant 0 : i32
    %c0_i32_1 = arith.constant 0 : i32
    return %c0_i32, %c0_i32_0 : i32, i32
  }
  func.func @transform_3(%arg0: i32) -> (i32, i32) {
    %c0_i32 = arith.constant 0 : i32
    %c0_i32_0 = arith.constant 0 : i32
    %c0_i32_1 = arith.constant 0 : i32
    return %c0_i32, %c0_i32_0 : i32, i32
  }
  func.func @transform_4(%arg0: i32) -> (i32, i32) {
    %c0_i32 = arith.constant 0 : i32
    %c0_i32_0 = arith.constant 0 : i32
    %c0_i32_1 = arith.constant 0 : i32
    return %c0_i32, %c0_i32_0 : i32, i32
  }
  func.func @transform_5(%arg0: i32) -> (i32, i32, i32) {
    %c0_i32 = arith.constant 0 : i32
    %c0_i32_0 = arith.constant 0 : i32
    %c0_i32_1 = arith.constant 0 : i32
    return %arg0, %c0_i32, %c0_i32_0 : i32, i32, i32
  }
}

</mosaic_0001>

<bundles_post_ra>
// kernel: squeeze_excitation.1
= control target key start
LH: loop header
LB: loop body
LE: loop exit
PB: predicated region body
PF: predicated region fallthrough
CT: control target
= control target key end

     0   :  { %s924_s18 = smov 0   ;;  %s1201_s0 = inlined_call_operand.vmem [shape: f32[4,64,256], index: 0, kind: input, shape index: {}]   ;;  %s1202_s1 = inlined_call_operand.vmem [shape: f32[64,4], index: 1, kind: input, shape index: {}]   ;;  %s1203_s2 = inlined_call_operand.vmem [shape: f32[1,4], index: 2, kind: input, shape index: {}]   ;;  %s1204_s3 = inlined_call_operand.vmem [shape: f32[4,64], index: 3, kind: input, shape index: {}]   ;;  %s1205_s4 = inlined_call_operand.vmem [shape: f32[1,64], index: 4, kind: input, shape index: {}]   ;;  %s1206_s5 = inlined_call_operand.vmem [shape: f32[4,64,256], index: 5, kind: output, shape index: {}]  }
   0x1 LB: > { %s814_s19 = sadd.s32 4294967295, %s890_s18   ;;  %p818_p0 = scmp.ge.s32.totalorder %s890_s18, 1  ;;  %s890_s18 = sphi %s924_s18, %s15_s18  }
   0x2   : > { %p189_p1 = scmp.lt.s32.totalorder %s890_s18, 3 }
   0x4   : > { %p190_p2 = pnand %p818_p0, %p189_p1 }
   0x6   : > { %193 = sbr.rel (%p190_p2) target bundleno = 769 (0x301), region = 40 }
   0xb   : > { %s819_s20 = sshll.u32 %s814_s19, 1  ;;  %v892_v48 = vmov 0.0   ;;  %v336_v49 = vld [vmem:[%s1202_s1 + $0x38] sm:$0xff]  ;;  %v335_v50 = vld [vmem:[%s1202_s1 + $0x30] sm:$0xff]  ;;  %v334_v51 = vld [vmem:[%s1202_s1 + $0x28] sm:$0xff]  ;;  %vm893_vm0 = vmmov 0   ;;  %v360_v61 = vlaneseq }
   0xc   : > { %p220_p3 = scmp.lt.s32.totalorder %s819_s20, 3  ;;  %846 = vmatprep.subr.mxu0 %v892_v48  ;;  %865 = vmatprep.subr.mxu1 %v892_v48  ;;  %v333_v52 = vld [vmem:[%s1202_s1 + $0x20] sm:$0xff]  ;;  %v332_v53 = vld [vmem:[%s1202_s1 + $0x18] sm:$0xff]  ;;  %v331_v54 = vld [vmem:[%s1202_s1 + $0x10] sm:$0xff]  ;;  %vm371_vm1 = vcmask 130112   ;;  %vm378_vm2 = vcmask 195712  }
   0xd   : > { %847 = vmatpush3.msra.mxu0 %v336_v49  ;;  %v330_v55 = vld [vmem:[%s1202_s1 + $0x8] sm:$0xff]  ;;  %v329_v56 = vld [vmem:[%s1202_s1] sm:$0xff]  ;;  %862 = vmatprep.mubr.msk.f32.mxu0 %vm893_vm0, %v892_v48  ;;  %vm385_vm3 = vcmask 261312   ;;  %vm392_vm4 = vcmask 326912   ;;  %vm399_vm5 = vcmask 392512   ;;  %vm406_vm6 = vcmask 458112  }
   0xe   : > { %s1229_s20 = smov (!%p220_p3, %s819_s20), 3  ;;  %848 = vmatprep.subr.mxu0 %v892_v48  ;;  %867 = vmatprep.mubr.msk.f32.mxu1 %vm893_vm0, %v892_v48  ;;  %vm413_vm7 = vcmask 523712   ;;  %vm454_vm8 = vcmask 1041409   ;;  %vm456_vm9 = vcmask 523264   ;;  %vm542_vm10 = vcmask 1043456  }
   0xf   : > { %s833_s21 = sshll.u32 %s1229_s20, 7  ;;  %849 = vmatpush3.msra.mxu0 %v335_v50  ;;  %vm538_vm11 = vcmask 31744  }
  0x10   : > { %s940_s24 = scalar_lea.vmem %s1201_s0, %s833_s21  ;;  %850 = vmatprep.subr.mxu0 %v892_v48  ;;  %s1132_s27 = scalar_lea.vmem %s1206_s5, %s833_s21 }
  0x11   : > { %v943_v0 = vld [vmem:[%s940_s24 + $0x80] sm:$0xff]  ;;  %v946_v1 = vld [vmem:[%s940_s24 + $0x88] sm:$0xff]  ;;  %v957_v5 = vld [vmem:[%s940_s24 + $0x90] sm:$0xff]  ;;  %851 = vmatpush3.msra.mxu0 %v334_v51 }
  0x12   : > { %v949_v2 = vld [vmem:[%s940_s24] sm:$0xff]  ;;  %v289_v3 = vadd.f32 %v946_v1, %v943_v0  ;;  %v954_v4 = vld [vmem:[%s940_s24 + $0x8] sm:$0xff]  ;;  %v960_v6 = vld [vmem:[%s940_s24 + $0x98] sm:$0xff]  ;;  %852 = vmatprep.subr.mxu0 %v892_v48 }
  0x13   : > { %v265_v7 = vadd.f32 %v954_v4, %v949_v2  ;;  %v965_v8 = vld [vmem:[%s940_s24 + $0x10] sm:$0xff]  ;;  %v968_v9 = vld [vmem:[%s940_s24 + $0x18] sm:$0xff]  ;;  %v292_v10 = vadd.f32 %v960_v6, %v957_v5  ;;  %v975_v12 = vld [vmem:[%s940_s24 + $0xa0] sm:$0xff]  ;;  %853 = vmatpush3.msra.mxu0 %v333_v52 }
  0x14   : > { %290 = vadd.xlane.f32.xlu1 %v289_v3  ;;  %v268_v11 = vadd.f32 %v968_v9, %v965_v8  ;;  %v978_v13 = vld [vmem:[%s940_s24 + $0xa8] sm:$0xff]  ;;  %v981_v14 = vld [vmem:[%s940_s24 + $0x20] sm:$0xff]  ;;  %v991_v18 = vld [vmem:[%s940_s24 + $0xb0] sm:$0xff]  ;;  %854 = vmatprep.subr.mxu0 %v892_v48  ;;  %v361_v3 = vand.u32 127, %v360_v61 }
  0x15   : > { %266 = vadd.xlane.f32.xlu0 %v265_v7  ;;  %v984_v15 = vld [vmem:[%s940_s24 + $0x28] sm:$0xff]  ;;  %v295_v16 = vadd.f32 %v978_v13, %v975_v12  ;;  %v994_v19 = vld [vmem:[%s940_s24 + $0xb8] sm:$0xff]  ;;  %v997_v20 = vld [vmem:[%s940_s24 + $0x30] sm:$0xff]  ;;  %855 = vmatpush3.msra.mxu0 %v332_v53 }
  0x16   : > { %v271_v17 = vadd.f32 %v984_v15, %v981_v14  ;;  %1214 = vst [vmem:[#allocation2_spill] sm:$0xff] %v994_v19  ;;  %v1000_v21 = vld [vmem:[%s940_s24 + $0x38] sm:$0xff]  ;;  %v298_v22 = vadd.f32 %v994_v19, %v991_v18  ;;  %v1007_v24 = vld [vmem:[%s940_s24 + $0xc0] sm:$0xff]  ;;  %v1010_v25 = vld [vmem:[%s940_s24 + $0xc8] sm:$0xff]  ;;  %856 = vmatprep.subr.mxu0 %v892_v48 }
  0x17   : > { %v274_v23 = vadd.f32 %v1000_v21, %v997_v20  ;;  %v1013_v26 = vld [vmem:[%s940_s24 + $0x40] sm:$0xff]  ;;  %v1016_v27 = vld [vmem:[%s940_s24 + $0x48] sm:$0xff]  ;;  %v301_v28 = vadd.f32 %v1010_v25, %v1007_v24  ;;  %v1023_v30 = vld [vmem:[%s940_s24 + $0xd0] sm:$0xff]  ;;  %857 = vmatpush3.msra.mxu0 %v331_v54 }
  0x18   : > { %293 = vadd.xlane.f32.xlu1 %v292_v10  ;;  %v277_v29 = vadd.f32 %v1016_v27, %v1013_v26  ;;  %1215 = vst [vmem:[#allocation3_spill] sm:$0xff] %v1023_v30  ;;  %v1026_v31 = vld [vmem:[%s940_s24 + $0xd8] sm:$0xff]  ;;  %v1029_v32 = vld [vmem:[%s940_s24 + $0x50] sm:$0xff]  ;;  %v1039_v36 = vld [vmem:[%s940_s24 + $0xe0] sm:$0xff]  ;;  %858 = vmatprep.subr.mxu0 %v892_v48  ;;  %v1094_v10 = vshrl.u32 %v360_v61, 7 }
  0x19   : > { %269 = vadd.xlane.f32.xlu0 %v268_v11  ;;  %1216 = vst [vmem:[#allocation4_spill] sm:$0xff] %v1026_v31  ;;  %v1032_v33 = vld [vmem:[%s940_s24 + $0x58] sm:$0xff]  ;;  %v304_v34 = vadd.f32 %v1026_v31, %v1023_v30  ;;  %1217 = vst [vmem:[#allocation5_spill] sm:$0xff] %v1039_v36  ;;  %v1042_v37 = vld [vmem:[%s940_s24 + $0xe8] sm:$0xff]  ;;  %859 = vmatpush3.msra.mxu0 %v330_v55 }
  0x1a   : > { %v280_v35 = vadd.f32 %v1032_v33, %v1029_v32  ;;  %1218 = vst [vmem:[#allocation6_spill] sm:$0xff] %v1042_v37  ;;  %v1045_v38 = vld [vmem:[%s940_s24 + $0x60] sm:$0xff]  ;;  %v1048_v39 = vld [vmem:[%s940_s24 + $0x68] sm:$0xff]  ;;  %v307_v40 = vadd.f32 %v1042_v37, %v1039_v36  ;;  %v1055_v42 = vld [vmem:[%s940_s24 + $0xf0] sm:$0xff]  ;;  %860 = vmatprep.subr.mxu0 %v892_v48 }
  0x1b   : > { %v283_v41 = vadd.f32 %v1048_v39, %v1045_v38  ;;  %1219 = vst [vmem:[#allocation7_spill] sm:$0xff] %v1055_v42  ;;  %v1058_v43 = vld [vmem:[%s940_s24 + $0xf8] sm:$0xff]  ;;  %v1061_v44 = vld [vmem:[%s940_s24 + $0x70] sm:$0xff]  ;;  %861 = vmatpush3.msra.mxu0 %v329_v56 }
  0x1c   : > { %296 = vadd.xlane.f32.xlu1 %v295_v16  ;;  %1220 = vst [vmem:[#allocation8_spill] sm:$0xff] %v1058_v43  ;;  %v1064_v45 = vld [vmem:[%s940_s24 + $0x78] sm:$0xff]  ;;  %v310_v46 = vadd.f32 %v1058_v43, %v1055_v42  ;;  %v366_v16 = vadd.s32 4294967288, %v361_v3 }
  0x1d   : > { %272 = vadd.xlane.f32.xlu0 %v271_v17  ;;  %v286_v47 = vadd.f32 %v1064_v45, %v1061_v44  ;;  %v373_v17 = vadd.s32 4294967280, %v361_v3 }
  0x20   : > { %299 = vadd.xlane.f32.xlu1 %v298_v22  ;;  %v380_v22 = vadd.s32 4294967272, %v361_v3 }
  0x21   : > { %275 = vadd.xlane.f32.xlu0 %v274_v23  ;;  %v387_v23 = vadd.s32 4294967264, %v361_v3 }
  0x22   : > { %v383_v48 = vsub.s32 %v380_v22, %v1094_v10 }
  0x23   : > { %v390_v49 = vsub.s32 %v387_v23, %v1094_v10  ;;  %v408_v23 = vadd.s32 4294967240, %v361_v3 }
  0x24   : > { %302 = vadd.xlane.f32.xlu1 %v301_v28 }
  0x25   : > { %278 = vadd.xlane.f32.xlu0 %v277_v29  ;;  %v394_v29 = vadd.s32 4294967256, %v361_v3 }
  0x27   : > { %v397_v52 = vsub.s32 %v394_v29, %v1094_v10 }
  0x28   : > { %305 = vadd.xlane.f32.xlu1 %v304_v34  ;;  %v364_v34 = vsub.s32 %v361_v3, %v1094_v10 }
  0x29   : > { %281 = vadd.xlane.f32.xlu0 %v280_v35 }
  0x2c   : > { %308 = vadd.xlane.f32.xlu1 %v307_v40  ;;  %v369_v40 = vsub.s32 %v366_v16, %v1094_v10 }
  0x2d   : > { %284 = vadd.xlane.f32.xlu0 %v283_v41  ;;  %v376_v41 = vsub.s32 %v373_v17, %v1094_v10 }
  0x30   : > { %311 = vadd.xlane.f32.xlu1 %v310_v46  ;;  %v401_v46 = vadd.s32 4294967248, %v361_v3  ;;  %v411_v3 = vsub.s32 %v408_v23, %v1094_v10  ;;  %v825_v23 = vld [vmem:[%s1203_s2] ss:$0 sm:$0xff] }
  0x31   : > { %287 = vadd.xlane.f32.xlu0 %v286_v47 }
  0x9d   : > { %v291_v57 = vpop.xlane.xlu1 %290 }
  0x9e   : > { %v267_v58 = vpop.xlane.xlu0 %266  ;;  %v321_v54 = vmul.f32 0.00390625, %v291_v57 }
  0x9f   : > { %v313_v16 = vmul.f32 0.00390625, %v267_v58 }
  0xa0   : > { %v418_v37 = vrot.slane %v321_v54, %v364_v34 }
  0xa1   : > { %v294_v59 = vpop.xlane.xlu1 %293  ;;  %v365_v19 = vrot.slane %v313_v16, %v364_v34 }
  0xa2   : > { %v270_v60 = vpop.xlane.xlu0 %269  ;;  %v322_v47 = vmul.f32 0.00390625, %v294_v59  ;;  %v404_v59 = vsub.s32 %v401_v46, %v1094_v10 }
  0xa3   : > { %v314_v50 = vmul.f32 0.00390625, %v270_v60 }
  0xa4   : > { %v422_v22 = vrot.slane %v322_v47, %v369_v40 }
  0xa5   : > { %v297_v62 = vpop.xlane.xlu1 %296  ;;  %v370_v60 = vrot.slane %v314_v50, %v369_v40 }
  0xa6   : > { %v273_v63 = vpop.xlane.xlu0 %272  ;;  %v323_v51 = vmul.f32 0.00390625, %v297_v62  ;;  %v423_v46 = vsel %vm371_vm1, %v422_v22, %v418_v37  ;;  %v530_v22 = vld [vmem:[%s1204_s3] sm:$0xf] }
  0xa7   : > { %v315_v55 = vmul.f32 0.00390625, %v273_v63  ;;  %v372_v40 = vsel %vm371_vm1, %v370_v60, %v365_v19  ;;  %866 = vmatpush3.msk.msra.mxu1 %vm542_vm10, %v530_v22  ;;  %v1223_v22 = vld [vmem:[#allocation6_spill] sm:$0xff] }
  0xa8   : > { %v427_v62 = vrot.slane %v323_v51, %v376_v41 }
  0xa9   : > { %v300_v7 = vpop.xlane.xlu1 %299  ;;  %v377_v57 = vrot.slane %v315_v55, %v376_v41 }
  0xaa   : > { %v276_v11 = vpop.xlane.xlu0 %275  ;;  %v324_v56 = vmul.f32 0.00390625, %v300_v7  ;;  %v428_v50 = vsel %vm378_vm2, %v427_v62, %v423_v46 }
  0xab   : > { %v316_v17 = vmul.f32 0.00390625, %v276_v11  ;;  %v379_v54 = vsel %vm378_vm2, %v377_v57, %v372_v40 }
  0xac   : > { %v432_v63 = vrot.slane %v324_v56, %v383_v48 }
  0xad   : > { %v303_v28 = vpop.xlane.xlu1 %302  ;;  %v384_v58 = vrot.slane %v316_v17, %v383_v48 }
  0xae   : > { %v279_v35 = vpop.xlane.xlu0 %278  ;;  %v325_v43 = vmul.f32 0.00390625, %v303_v28  ;;  %v433_v34 = vsel %vm385_vm3, %v432_v63, %v428_v50  ;;  %v827_v63 = vld [vmem:[%s1205_s4] ss:$0 sm:$0xff]  ;;  %v659_v50 = vsub.s32 1, %v1094_v10 }
  0xaf   : > { %v317_v42 = vmul.f32 0.00390625, %v279_v35  ;;  %v386_v37 = vsel %vm385_vm3, %v384_v58, %v379_v54 }
  0xb0   : > { %v437_v11 = vrot.slane %v325_v43, %v390_v49 }
  0xb1   : > { %v306_v53 = vpop.xlane.xlu1 %305  ;;  %v391_v47 = vrot.slane %v317_v42, %v390_v49 }
  0xb2   : > { %v282_v61 = vpop.xlane.xlu0 %281  ;;  %v326_v31 = vmul.f32 0.00390625, %v306_v53 }
  0xb3   : > { %v318_v30 = vmul.f32 0.00390625, %v282_v61  ;;  %v393_v19 = vsel %vm392_vm4, %v391_v47, %v386_v37 }
  0xb4   : > { %v442_v35 = vrot.slane %v326_v31, %v397_v52  ;;  %v438_v31 = vsel %vm392_vm4, %v437_v11, %v433_v34 }
  0xb5   : > { %v309_v29 = vpop.xlane.xlu1 %308  ;;  %v398_v51 = vrot.slane %v318_v30, %v397_v52 }
  0xb6   : > { %v327_v7 = vmul.f32 0.00390625, %v309_v29  ;;  %v285_v36 = vpop.xlane.xlu0 %284  ;;  %v443_v49 = vsel %vm399_vm5, %v442_v35, %v438_v31  ;;  %v624_v35 = vsub.s32 0, %v1094_v10 }
  0xb7   : > { %v319_v28 = vmul.f32 0.00390625, %v285_v36  ;;  %v400_v52 = vsel %vm399_vm5, %v398_v51, %v393_v19 }
  0xb8   : > { %v447_v53 = vrot.slane %v327_v7, %v404_v59 }
  0xb9   : > { %v312_v41 = vpop.xlane.xlu1 %311  ;;  %v405_v48 = vrot.slane %v319_v28, %v404_v59 }
  0xba   : > { %v328_v43 = vmul.f32 0.00390625, %v312_v41  ;;  %v288_v36 = vpop.xlane.xlu0 %287  ;;  %v448_v55 = vsel %vm406_vm6, %v447_v53, %v443_v49 }
  0xbb   : > { %v320_v42 = vmul.f32 0.00390625, %v288_v36  ;;  %v407_v61 = vsel %vm406_vm6, %v405_v48, %v400_v52 }
  0xbc   : > { %v452_v30 = vrot.slane %v328_v43, %v411_v3 }
  0xbd   : > { %v412_v56 = vrot.slane %v320_v42, %v411_v3 }
  0xbe   : > { %v453_v16 = vsel %vm413_vm7, %v452_v30, %v448_v55 }
  0xbf   : > { %v414_v17 = vsel %vm413_vm7, %v412_v56, %v407_v61 }
  0xc0   : > { %v455_v59 = vsel %vm454_vm8, %v453_v16, %v414_v17  ;;  %v1221_v17 = vld [vmem:[#allocation2_spill] sm:$0xff] }
  0xc1   : > { %863 = vmatmul.mubr.msk.f32.vlgmr.msra.gmra.mxu0 %vm456_vm9, %v455_v59  ;;  %v1222_v59 = vld [vmem:[#allocation5_spill] sm:$0xff] }
 0x181   : > { %v525_v60 = vpop.f32.mrf.mxu0 }
 0x182   : > { %v526_v62 = vadd.f32 %v825_v23, %v525_v60  ;;  %v1224_v23 = vld [vmem:[#allocation3_spill] sm:$0xff] }
 0x183   : > { %v864_v29 = vpop.f32.mrf.mxu0 }
 0x184   : > { %v529_v57 = vmax.f32 %v526_v62, 0.0  ;;  %v1225_v62 = vld [vmem:[#allocation4_spill] sm:$0xff] }
 0x186   : > { %868 = vmatmul.mubr.msk.f32.vlgmr.msra.gmra.mxu1 %vm538_vm11, %v529_v57  ;;  %v1226_v57 = vld [vmem:[#allocation7_spill] sm:$0xff] }
 0x246   : > { %v612_v7 = vpop.f32.mrf.mxu1 }
 0x247   : > { %v613_v58 = vadd.f32 %v827_v63, %v612_v7  ;;  %v1227_v7 = vld [vmem:[#allocation8_spill] sm:$0xff] }
 0x248   : > { %v869_v11 = vpop.f32.mrf.mxu1 }
 0x249   : > { %v830_v28 = vmul.f32 -1.442695, %v613_v58 }
 0x24b   : > { %880 = vpow2.f32 %v830_v28 }
 0x258   : > { %v881_v46 = vpop.eup %880 }
 0x259   : > { %v619_v47 = vadd.f32 1.0, %v881_v46 }
 0x25b   : > { %882 = vrcp.f32 %v619_v47 }
 0x268   : > { %v883_v3 = vpop.eup %882 }
 0x269   : > { %v625_v40 = vrot.slane %v883_v3, %v624_v35  ;;  %v660_v51 = vrot.slane %v883_v3, %v659_v50 }
 0x26b   : > { %631 = vbcast.lane.b32.xlu1 %v625_v40, 264  ;;  %627 = vbcast.lane.b32.xlu0 %v625_v40, 256 }
 0x26f   : > { %635 = vbcast.lane.b32.xlu1 %v625_v40, 272  ;;  %643 = vbcast.lane.b32.xlu0 %v625_v40, 288 }
 0x273   : > { %639 = vbcast.lane.b32.xlu1 %v625_v40, 280  ;;  %651 = vbcast.lane.b32.xlu0 %v625_v40, 304 }
 0x277   : > { %647 = vbcast.lane.b32.xlu1 %v625_v40, 296  ;;  %662 = vbcast.lane.b32.xlu0 %v660_v51, 256 }
 0x27b   : > { %655 = vbcast.lane.b32.xlu1 %v625_v40, 312  ;;  %670 = vbcast.lane.b32.xlu0 %v660_v51, 272 }
 0x27f   : > { %666 = vbcast.lane.b32.xlu1 %v660_v51, 264  ;;  %678 = vbcast.lane.b32.xlu0 %v660_v51, 288 }
 0x283   : > { %674 = vbcast.lane.b32.xlu1 %v660_v51, 280  ;;  %686 = vbcast.lane.b32.xlu0 %v660_v51, 304 }
 0x287   : > { %682 = vbcast.lane.b32.xlu1 %v660_v51, 296 }
 0x28b   : > { %690 = vbcast.lane.b32.xlu1 %v660_v51, 312 }
 0x2dd   : > { %v632_v10 = vpop.permute.xlu1 %631  ;;  %v628_v53 = vpop.permute.xlu0 %627 }
 0x2de   : > { %v694_v41 = vmul.f32 %v632_v10, %v965_v8  ;;  %v695_v54 = vmul.f32 %v632_v10, %v968_v9  ;;  %v692_v34 = vmul.f32 %v628_v53, %v949_v2  ;;  %v693_v48 = vmul.f32 %v628_v53, %v954_v4 }
 0x2e0   : > { %726 = vst [vmem:[%s1132_s27 + $0x10] sm:$0xff] %v694_v41  ;;  %727 = vst [vmem:[%s1132_s27 + $0x18] sm:$0xff] %v695_v54 }
 0x2e1   : > { %724 = vst [vmem:[%s1132_s27] sm:$0xff] %v692_v34  ;;  %725 = vst [vmem:[%s1132_s27 + $0x8] sm:$0xff] %v693_v48  ;;  %v636_v43 = vpop.permute.xlu1 %635  ;;  %v644_v36 = vpop.permute.xlu0 %643 }
 0x2e2   : > { %v696_v37 = vmul.f32 %v636_v43, %v981_v14  ;;  %v697_v8 = vmul.f32 %v636_v43, %v984_v15  ;;  %v700_v9 = vmul.f32 %v644_v36, %v1013_v26  ;;  %v701_v2 = vmul.f32 %v644_v36, %v1016_v27 }
 0x2e4   : > { %728 = vst [vmem:[%s1132_s27 + $0x20] sm:$0xff] %v696_v37  ;;  %729 = vst [vmem:[%s1132_s27 + $0x28] sm:$0xff] %v697_v8 }
 0x2e5   : > { %732 = vst [vmem:[%s1132_s27 + $0x40] sm:$0xff] %v700_v9  ;;  %733 = vst [vmem:[%s1132_s27 + $0x48] sm:$0xff] %v701_v2  ;;  %v640_v4 = vpop.permute.xlu1 %639  ;;  %v652_v31 = vpop.permute.xlu0 %651 }
 0x2e6   : > { %v698_v42 = vmul.f32 %v640_v4, %v997_v20  ;;  %v699_v14 = vmul.f32 %v640_v4, %v1000_v21  ;;  %v704_v15 = vmul.f32 %v652_v31, %v1045_v38  ;;  %v705_v26 = vmul.f32 %v652_v31, %v1048_v39 }
 0x2e8   : > { %730 = vst [vmem:[%s1132_s27 + $0x30] sm:$0xff] %v698_v42  ;;  %731 = vst [vmem:[%s1132_s27 + $0x38] sm:$0xff] %v699_v14 }
 0x2e9   : > { %736 = vst [vmem:[%s1132_s27 + $0x60] sm:$0xff] %v704_v15  ;;  %737 = vst [vmem:[%s1132_s27 + $0x68] sm:$0xff] %v705_v26  ;;  %v648_v27 = vpop.permute.xlu1 %647  ;;  %v663_v19 = vpop.permute.xlu0 %662 }
 0x2ea   : > { %v702_v49 = vmul.f32 %v648_v27, %v1029_v32  ;;  %v703_v20 = vmul.f32 %v648_v27, %v1032_v33  ;;  %v708_v21 = vmul.f32 %v663_v19, %v943_v0  ;;  %v709_v38 = vmul.f32 %v663_v19, %v946_v1 }
 0x2ec   : > { %734 = vst [vmem:[%s1132_s27 + $0x50] sm:$0xff] %v702_v49  ;;  %735 = vst [vmem:[%s1132_s27 + $0x58] sm:$0xff] %v703_v20 }
 0x2ed   : > { %740 = vst [vmem:[%s1132_s27 + $0x80] sm:$0xff] %v708_v21  ;;  %741 = vst [vmem:[%s1132_s27 + $0x88] sm:$0xff] %v709_v38  ;;  %v656_v39 = vpop.permute.xlu1 %655  ;;  %v671_v30 = vpop.permute.xlu0 %670 }
 0x2ee   : > { %v706_v52 = vmul.f32 %v656_v39, %v1061_v44  ;;  %v707_v32 = vmul.f32 %v656_v39, %v1064_v45  ;;  %v712_v33 = vmul.f32 %v671_v30, %v975_v12  ;;  %v713_v0 = vmul.f32 %v671_v30, %v978_v13 }
 0x2f0   : > { %738 = vst [vmem:[%s1132_s27 + $0x70] sm:$0xff] %v706_v52  ;;  %739 = vst [vmem:[%s1132_s27 + $0x78] sm:$0xff] %v707_v32 }
 0x2f1   : > { %744 = vst [vmem:[%s1132_s27 + $0xa0] sm:$0xff] %v712_v33  ;;  %745 = vst [vmem:[%s1132_s27 + $0xa8] sm:$0xff] %v713_v0  ;;  %v667_v1 = vpop.permute.xlu1 %666  ;;  %v679_v55 = vpop.permute.xlu0 %678 }
 0x2f2   : > { %v710_v56 = vmul.f32 %v667_v1, %v957_v5  ;;  %v711_v44 = vmul.f32 %v667_v1, %v960_v6  ;;  %v716_v45 = vmul.f32 %v679_v55, %v1007_v24  ;;  %v717_v12 = vmul.f32 %v679_v55, %v1010_v25 }
 0x2f4   : > { %742 = vst [vmem:[%s1132_s27 + $0x90] sm:$0xff] %v710_v56  ;;  %743 = vst [vmem:[%s1132_s27 + $0x98] sm:$0xff] %v711_v44 }
 0x2f5   : > { %748 = vst [vmem:[%s1132_s27 + $0xc0] sm:$0xff] %v716_v45  ;;  %749 = vst [vmem:[%s1132_s27 + $0xc8] sm:$0xff] %v717_v12  ;;  %v675_v13 = vpop.permute.xlu1 %674  ;;  %v687_v61 = vpop.permute.xlu0 %686 }
 0x2f6   : > { %v714_v16 = vmul.f32 %v675_v13, %v991_v18  ;;  %v715_v5 = vmul.f32 %v675_v13, %v1221_v17  ;;  %v720_v6 = vmul.f32 %v687_v61, %v1222_v59  ;;  %v721_v24 = vmul.f32 %v687_v61, %v1223_v22 }
 0x2f8   : > { %746 = vst [vmem:[%s1132_s27 + $0xb0] sm:$0xff] %v714_v16  ;;  %747 = vst [vmem:[%s1132_s27 + $0xb8] sm:$0xff] %v715_v5 }
 0x2f9   : > { %752 = vst [vmem:[%s1132_s27 + $0xe0] sm:$0xff] %v720_v6  ;;  %753 = vst [vmem:[%s1132_s27 + $0xe8] sm:$0xff] %v721_v24  ;;  %v683_v25 = vpop.permute.xlu1 %682 }
 0x2fa   : > { %v718_v60 = vmul.f32 %v683_v25, %v1224_v23  ;;  %v719_v29 = vmul.f32 %v683_v25, %v1225_v62 }
 0x2fc   : > { %750 = vst [vmem:[%s1132_s27 + $0xd0] sm:$0xff] %v718_v60  ;;  %751 = vst [vmem:[%s1132_s27 + $0xd8] sm:$0xff] %v719_v29 }
 0x2fd   : > { %v691_v18 = vpop.permute.xlu1 %690 }
 0x2fe   : > { %v722_v63 = vmul.f32 %v691_v18, %v1226_v57  ;;  %v723_v58 = vmul.f32 %v691_v18, %v1227_v7 }
 0x300   : > { %754 = vst [vmem:[%s1132_s27 + $0xf0] sm:$0xff] %v722_v63  ;;  %755 = vst [vmem:[%s1132_s27 + $0xf8] sm:$0xff] %v723_v58 }
 0x301 PF: > { %s15_s18 = sadd.s32 1, %s890_s18  }
 0x302   : > { %p12_p4 = scmp.ge.s32.totalorder %s15_s18, 4  }
 0x304   :  { %14 = sbr.rel (!%p12_p4) target bundleno = 1 (0x1), region = 70 }

</bundles_post_ra>
